<compile_context>
chip_gen: v5e
topology: v5e:2x2
jax: 0.10.0
libtpu: 0.0.40
codegen_flags: <defaults>
</compile_context>

<pallas_src>
import functools

import numpy as np
import jax
import jax.numpy as jnp
from jax.experimental import pallas as pl
from jax.experimental.pallas import tpu as pltpu


SEM_IN = 64      # real semantic feature width (reference: Two_classrelationshipfusion(in_size=64))
SEM_PAD = 128    # padded, lane-dense width used inside the kernel
OUT_PAD = 128    # padded output-projection width (sliced to out_dim outside)


# ----------------------------------------------------------------------------
# Fused forward kernel (single invocation, full arrays resident in VMEM)
# ----------------------------------------------------------------------------
def _fused_forward_kernel(
    x0_ref, w0_ref, b0_ref,          # feature encoder (only h_all[0] is used downstream)
    adjf_ref, sim_ref, wrel_ref,     # routed adjacencies flattened to (M*N, N), simlar, stacked rel weights
    sw1_ref, sb1_ref, sw2_ref,       # shared semantic-attention params (w2 as a (1, H) row)
    pw_ref, pb_ref,                  # padded output projection
    a_out_ref, h_out_ref,            # outputs: (N, OUT_PAD), (N, SEM_PAD) -- lane-dense stores
    *, mix_flags, m_outer, m_inner, n_nodes):
    f32 = jnp.float32
    bf16 = jnp.bfloat16
    n = n_nodes
    m_total = m_outer + m_inner

    # ---- feature encoder: h0 = relu(x0 @ W0 + b0)   (bf16 MXU, f32 accumulate)
    h0 = jnp.dot(x0_ref[...], w0_ref[...], preferred_element_type=f32) + b0_ref[...]
    h0 = jnp.maximum(h0, 0.0)
    h0b = h0.astype(bf16)

    # ---- batched relation propagation: one (M*N, N) @ (N, hid) matmul
    msg_all = jnp.dot(adjf_ref[...], h0b, preferred_element_type=f32)        # (M*N, hid) f32

    # shared simlar propagation, computed once (only if some relation mixes it)
    if any(mix_flags):
        sim_msg = jnp.dot(sim_ref[...], h0b, preferred_element_type=f32)     # (N, hid) f32

    # ---- per-relation projection to the padded semantic width (kept in vregs)
    z_parts = []
    for m in range(m_total):
        msg_m = msg_all[m * n:(m + 1) * n, :]
        if mix_flags[m]:
            msg_m = 0.5 * (msg_m + sim_msg)                                  # VPU add, no NxN temp
        zm = jnp.maximum(
            jnp.dot(msg_m.astype(bf16), wrel_ref[m], preferred_element_type=f32), 0.0)
        z_parts.append(zm)                                                   # (N, SEM_PAD)
    z_all = jnp.concatenate(z_parts, axis=0)                                 # (M*N, SEM_PAD) f32
    z_bf = z_all.astype(bf16)

    w1 = sw1_ref[...]        # (SEM_PAD, H) bf16
    b1 = sb1_ref[...]        # (1, H) f32
    w2 = sw2_ref[...]        # (1, H) f32  -- score row vector

    # One batched projection for every relation of both branches, then a VPU
    # multiply-and-reduce for the scores (no 1-lane-wide MXU output).
    hp = jnp.tanh(jnp.dot(z_bf, w1, preferred_element_type=f32) + b1)        # (M*N, H) f32
    s_all = jnp.sum(hp * w2, axis=-1, keepdims=True)                         # (M*N, 1) f32

    inv_n = 1.0 / n

    def fuse(rel_ids):
        # Two_classrelationshipfusion: mean over nodes, softmax over relations,
        # beta-weighted sum of the relation features.
        scores = [jnp.sum(s_all[r * n:(r + 1) * n], keepdims=True) * inv_n
                  for r in rel_ids]                                          # (1,1) each
        mx = scores[0]
        for sc in scores[1:]:
            mx = jnp.maximum(mx, sc)
        exps = [jnp.exp(sc - mx) for sc in scores]
        den = exps[0]
        for e in exps[1:]:
            den = den + e
        inv_den = pl.reciprocal(den, approx=True)
        out = None
        for j, r in enumerate(rel_ids):
            term = (exps[j] * inv_den) * z_all[r * n:(r + 1) * n, :]
            out = term if out is None else out + term
        return out                                                           # (N, SEM_PAD)

    ho = fuse(list(range(m_outer)))
    hi = fuse(list(range(m_outer, m_total)))

    # ---- final fusion over the two branch outputs (same shared attention params)
    def branch_score(zb):
        hpb = jnp.tanh(jnp.dot(zb.astype(bf16), w1, preferred_element_type=f32) + b1)
        sb = jnp.sum(hpb * w2, axis=-1, keepdims=True)                       # (N, 1)
        return jnp.sum(sb, keepdims=True) * inv_n                            # (1, 1)

    s_o = branch_score(ho)
    s_i = branch_score(hi)
    mx = jnp.maximum(s_o, s_i)
    e_o = jnp.exp(s_o - mx)
    e_i = jnp.exp(s_i - mx)
    inv_den = pl.reciprocal(e_o + e_i, approx=True)
    h = (e_o * inv_den) * ho + (e_i * inv_den) * hi                          # (N, SEM_PAD), pad lanes = 0

    h_out_ref[...] = h                                                       # lane-dense (128) store
    # fused output projection, 128-lane-dense store (sliced to out_dim outside)
    a_out_ref[...] = (jnp.dot(h.astype(bf16), pw_ref[...], preferred_element_type=f32)
                      + pb_ref[...])


def fused_forward(x0, w0, b0, adj_flat, simlar, wrel_stack,
                  sem_w1, sem_b1, sem_w2_row, proj_w, proj_b,
                  mix_flags, m_outer, m_inner, n_nodes):
    kernel = functools.partial(
        _fused_forward_kernel,
        mix_flags=tuple(bool(f) for f in mix_flags),
        m_outer=int(m_outer), m_inner=int(m_inner), n_nodes=int(n_nodes))

    args = (x0, w0, b0, adj_flat, simlar, wrel_stack,
            sem_w1, sem_b1, sem_w2_row, proj_w, proj_b)
    vmem = lambda: pl.BlockSpec(memory_space=pltpu.MemorySpace.VMEM)
    return pl.pallas_call(
        kernel,
        out_shape=(jax.ShapeDtypeStruct((n_nodes, OUT_PAD), jnp.float32),
                   jax.ShapeDtypeStruct((n_nodes, SEM_PAD), jnp.float32)),
        in_specs=[vmem() for _ in args],
        out_specs=(vmem(), vmem()),
    )(*args)


# ----------------------------------------------------------------------------
# Parameters (deterministic, synthetic).  Padding to lane-dense widths and the
# bf16 MXU cast are done ONCE here, not per forward call.
# ----------------------------------------------------------------------------
def init_params(key, input_dim, hid_dim, out_dim, n_adjo, n_adji, sem_hidden=128):
    keys = iter(jax.random.split(key, 64))
    bf16 = jnp.bfloat16
    p = {"out_dim": out_dim}

    p["fc"] = []
    for d in input_dim:
        w = (jax.random.normal(next(keys), (d, hid_dim), jnp.float32) * 0.1).astype(bf16)
        b = jax.random.normal(next(keys), (1, hid_dim), jnp.float32) * 0.1
        p["fc"].append((w, b))

    def rel_weight():
        w = jax.random.normal(next(keys), (hid_dim, SEM_IN), jnp.float32) * 0.1
        return jnp.pad(w, ((0, 0), (0, SEM_PAD - SEM_IN))).astype(bf16)      # (hid, 128)

    # stand-in per-relation projection weights (hid_dim -> 64, zero-padded to 128 lanes)
    p["rel_o"] = [rel_weight() for _ in range(n_adjo)]
    p["rel_i"] = [rel_weight() for _ in range(n_adji)]

    # Two_classrelationshipfusion(in_size=64, hidden_size=128); w1 rows padded
    # (padded z lanes are zero, so the extra rows never contribute), w2 kept as
    # a (1, hidden) row so the kernel scores with a VPU multiply-and-reduce.
    w1 = jax.random.normal(next(keys), (SEM_IN, sem_hidden), jnp.float32) * 0.1
    p["sem_w1"] = jnp.pad(w1, ((0, SEM_PAD - SEM_IN), (0, 0))).astype(bf16)
    p["sem_b1"] = jax.random.normal(next(keys), (1, sem_hidden), jnp.float32) * 0.1
    p["sem_w2"] = jax.random.normal(next(keys), (1, sem_hidden), jnp.float32) * 0.1

    # final project: Linear(64, out_dim), zero-padded to a 128x128 lane-dense matmul
    pw = jax.random.normal(next(keys), (SEM_IN, out_dim), jnp.float32) * 0.1
    p["proj_w"] = jnp.pad(pw, ((0, SEM_PAD - SEM_IN), (0, OUT_PAD - out_dim))).astype(bf16)
    pb = jax.random.normal(next(keys), (1, out_dim), jnp.float32) * 0.1
    p["proj_b"] = jnp.pad(pb, ((0, 0), (0, OUT_PAD - out_dim)))
    return p


# ----------------------------------------------------------------------------
# Forward pass: host decides routing (module STRUCTURE), one fused kernel runs it
# ----------------------------------------------------------------------------
def degree_analyze(degree):
    degree = [float(v) for v in degree]
    min_value = float(np.min(degree))
    eps = 1e-6
    if min_value == 0:
        min_value = eps
    return [(v - min_value) / (min_value + eps) * 100.0 for v in degree]


def models_forward(params, features, adjo, adji, simlar):
    n = features[0].shape[0]
    n_o = len(adjo)

    # Degree routing: stack all adjacencies ONCE, one batched sum, ONE
    # device->host pull.  The routing is data-dependent module structure
    # (which extractor each relation goes through), so it is a host decision.
    all_adj = jnp.stack(list(adjo) + list(adji))                     # (n_o+n_i, N, N)
    deg = np.asarray(jnp.sum(all_adj, axis=(1, 2)))                  # single host sync
    rd = degree_analyze(deg[:n_o])
    rdi = degree_analyze(deg[n_o:])

    big_adj = [i for i in range(len(rd)) if rd[i] >= 30]
    small_adj = [i for i in range(len(rd)) if rd[i] < 30]
    big_adji = [m for m in range(len(rdi)) if rdi[m] <= 30]
    small_adji = [m for m in range(len(rdi)) if rdi[m] > 30]

    # Routed relation order matches the reference (big then small, outer then
    # inner).  mix flag = fold simlar into the propagation.
    #   outer-big   : HAN2(adjo[i], h)           -> A = adjo[i],          no mix
    #   outer-small : PageRank2(h, adjo[i], sim) -> A = .5*(adjo[i]+sim),  mix
    #   inner-big   : HAN1(adjo[m], h, sim)      -> A = .5*(adjo[m]+sim),  mix  (adjo quirk kept)
    #   inner-small : PageRank1(h, adji[m])      -> A = adji[m],           no mix
    sel_idx, w_sel, mix_flags = [], [], []
    for i in big_adj:
        sel_idx.append(i); w_sel.append(params["rel_o"][i]); mix_flags.append(False)
    for i in small_adj:
        sel_idx.append(i); w_sel.append(params["rel_o"][i]); mix_flags.append(True)
    m_outer = len(sel_idx)
    for m in big_adji:
        sel_idx.append(m)          # reference quirk: indexes adjo, not adji
        w_sel.append(params["rel_i"][m]); mix_flags.append(True)
    for m in small_adji:
        sel_idx.append(n_o + m)    # adji[m]
        w_sel.append(params["rel_i"][m]); mix_flags.append(False)
    m_inner = len(sel_idx) - m_outer
    assert m_outer >= 1 and m_inner >= 1, "each branch needs at least one relation"

    m_total = len(sel_idx)
    adj_flat = all_adj[np.asarray(sel_idx)].reshape(m_total * n, n).astype(jnp.bfloat16)
    wrel_stack = jnp.stack(w_sel)                                    # (M, hid, 128) bf16

    # Note: the reference computes h_all[i] for every feature type but only
    # h_all[0] is consumed downstream, so only the first encoder is evaluated.
    a_pad, h_pad = fused_forward(
        features[0].astype(jnp.bfloat16),
        params["fc"][0][0], params["fc"][0][1],
        adj_flat, simlar.astype(jnp.bfloat16), wrel_stack,
        params["sem_w1"], params["sem_b1"], params["sem_w2"],
        params["proj_w"], params["proj_b"],
        mix_flags, m_outer, m_inner, n)

    # strip the lane padding back to the module's real widths
    return a_pad[:, :params["out_dim"]], h_pad[:, :SEM_IN]


# ----------------------------------------------------------------------------
if __name__ == "__main__":
    key = jax.random.PRNGKey(0)
    N = 16                       # nodes
    input_dim = [20, 24]         # two feature types
    hid_dim = 128                # lane-dense hidden width
    out_dim = 3
    n_rel = 2                    # relations per adjacency set

    ks = jax.random.split(key, 16)
    features = [
        jax.random.normal(ks[0], (N, input_dim[0]), jnp.float32),
        jax.random.normal(ks[1], (N, input_dim[1]), jnp.float32),
    ]
    # deterministic dense 0/1 adjacency matrices with different densities so
    # all four degree-routing branches get exercised
    adjo = [
        (jax.random.uniform(ks[2], (N, N)) > 0.7).astype(jnp.float32),
        (jax.random.uniform(ks[3], (N, N)) > 0.3).astype(jnp.float32),
    ]
    adji = [
        (jax.random.uniform(ks[4], (N, N)) > 0.7).astype(jnp.float32),
        (jax.random.uniform(ks[5], (N, N)) > 0.4).astype(jnp.float32),
    ]
    simlar = jax.random.uniform(ks[6], (N, N), dtype=jnp.float32)

    params = init_params(ks[7], input_dim, hid_dim, out_dim, n_rel, n_rel)

    a, h = models_forward(params, features, adjo, adji, simlar)
    jax.block_until_ready((a, h))
    assert a.shape == (N, out_dim), a.shape
    assert h.shape == (N, SEM_IN), h.shape
    assert bool(jnp.all(jnp.isfinite(a))) and bool(jnp.all(jnp.isfinite(h)))
    print("KERNEL_OK")
</pallas_src>

<mosaic_0001>
module attributes {stable_mosaic.version = 11 : i64} {
  func.func @_fused_forward_kernel(%arg0: memref<16x20xbf16, #tpu.memory_space<vmem>>, %arg1: memref<20x128xbf16, #tpu.memory_space<vmem>>, %arg2: memref<1x128xf32, #tpu.memory_space<vmem>>, %arg3: memref<64x16xbf16, #tpu.memory_space<vmem>>, %arg4: memref<16x16xbf16, #tpu.memory_space<vmem>>, %arg5: memref<4x128x128xbf16, #tpu.memory_space<vmem>>, %arg6: memref<128x128xbf16, #tpu.memory_space<vmem>>, %arg7: memref<1x128xf32, #tpu.memory_space<vmem>>, %arg8: memref<1x128xf32, #tpu.memory_space<vmem>>, %arg9: memref<128x128xbf16, #tpu.memory_space<vmem>>, %arg10: memref<1x128xf32, #tpu.memory_space<vmem>>, %arg11: memref<16x128xf32, #tpu.memory_space<vmem>>, %arg12: memref<16x128xf32, #tpu.memory_space<vmem>>) attributes {dimension_semantics = [], scalar_prefetch = 0 : i64, scratch_operands = 0 : i64, tpu.core_type = #tpu.core_type<tc>} {
    %c0 = arith.constant 0 : index
    %c0_0 = arith.constant 0 : index
    %0 = vector.load %arg0[%c0, %c0_0] : memref<16x20xbf16, #tpu.memory_space<vmem>>, vector<16x20xbf16>
    %c0_1 = arith.constant 0 : index
    %c0_2 = arith.constant 0 : index
    %1 = vector.load %arg1[%c0_1, %c0_2] : memref<20x128xbf16, #tpu.memory_space<vmem>>, vector<20x128xbf16>
    %cst = arith.constant dense<0.000000e+00> : vector<16x128xf32>
    %2 = tpu.matmul %0, %1, %cst {dimension_numbers = #tpu.dot_dimension_numbers<[1], [0], [0], [1], [0, 0, 1, 1], [], []>} : vector<16x20xbf16>, vector<20x128xbf16>, vector<16x128xf32> -> vector<16x128xf32>
    %c0_3 = arith.constant 0 : index
    %c0_4 = arith.constant 0 : index
    %3 = vector.load %arg2[%c0_3, %c0_4] : memref<1x128xf32, #tpu.memory_space<vmem>>, vector<1x128xf32>
    %4 = vector.broadcast %3 : vector<1x128xf32> to vector<16x128xf32>
    %5 = arith.addf %2, %4 : vector<16x128xf32>
    %cst_5 = arith.constant 0.000000e+00 : f32
    %6 = vector.broadcast %cst_5 : f32 to vector<16x128xf32>
    %7 = arith.maximumf %5, %6 : vector<16x128xf32>
    %8 = arith.truncf %7 : vector<16x128xf32> to vector<16x128xbf16>
    %c0_6 = arith.constant 0 : index
    %c0_7 = arith.constant 0 : index
    %9 = vector.load %arg3[%c0_6, %c0_7] : memref<64x16xbf16, #tpu.memory_space<vmem>>, vector<64x16xbf16>
    %cst_8 = arith.constant dense<0.000000e+00> : vector<64x128xf32>
    %10 = tpu.matmul %9, %8, %cst_8 {dimension_numbers = #tpu.dot_dimension_numbers<[1], [0], [0], [1], [0, 0, 1, 1], [], []>} : vector<64x16xbf16>, vector<16x128xbf16>, vector<64x128xf32> -> vector<64x128xf32>
    %c0_9 = arith.constant 0 : index
    %c0_10 = arith.constant 0 : index
    %11 = vector.load %arg4[%c0_9, %c0_10] : memref<16x16xbf16, #tpu.memory_space<vmem>>, vector<16x16xbf16>
    %cst_11 = arith.constant dense<0.000000e+00> : vector<16x128xf32>
    %12 = tpu.matmul %11, %8, %cst_11 {dimension_numbers = #tpu.dot_dimension_numbers<[1], [0], [0], [1], [0, 0, 1, 1], [], []>} : vector<16x16xbf16>, vector<16x128xbf16>, vector<16x128xf32> -> vector<16x128xf32>
    %13 = vector.extract_strided_slice %10 {offsets = [0, 0], sizes = [16, 128], strides = [1, 1]} : vector<64x128xf32> to vector<16x128xf32>
    %14 = arith.truncf %13 : vector<16x128xf32> to vector<16x128xbf16>
    %c0_12 = arith.constant 0 : index
    %c0_13 = arith.constant 0 : index
    %c0_14 = arith.constant 0 : index
    %15 = vector.load %arg5[%c0_12, %c0_13, %c0_14] : memref<4x128x128xbf16, #tpu.memory_space<vmem>>, vector<1x128x128xbf16>
    %16 = vector.shape_cast %15 : vector<1x128x128xbf16> to vector<128x128xbf16>
    %cst_15 = arith.constant dense<0.000000e+00> : vector<16x128xf32>
    %17 = tpu.matmul %14, %16, %cst_15 {dimension_numbers = #tpu.dot_dimension_numbers<[1], [0], [0], [1], [0, 0, 1, 1], [], []>} : vector<16x128xbf16>, vector<128x128xbf16>, vector<16x128xf32> -> vector<16x128xf32>
    %cst_16 = arith.constant 0.000000e+00 : f32
    %18 = vector.broadcast %cst_16 : f32 to vector<16x128xf32>
    %19 = arith.maximumf %17, %18 : vector<16x128xf32>
    %20 = vector.extract_strided_slice %10 {offsets = [16, 0], sizes = [16, 128], strides = [1, 1]} : vector<64x128xf32> to vector<16x128xf32>
    %21 = arith.addf %20, %12 : vector<16x128xf32>
    %cst_17 = arith.constant 5.000000e-01 : f32
    %22 = vector.broadcast %cst_17 : f32 to vector<16x128xf32>
    %23 = arith.mulf %22, %21 : vector<16x128xf32>
    %24 = arith.truncf %23 : vector<16x128xf32> to vector<16x128xbf16>
    %c1 = arith.constant 1 : index
    %c0_18 = arith.constant 0 : index
    %c0_19 = arith.constant 0 : index
    %25 = vector.load %arg5[%c1, %c0_18, %c0_19] : memref<4x128x128xbf16, #tpu.memory_space<vmem>>, vector<1x128x128xbf16>
    %26 = vector.shape_cast %25 : vector<1x128x128xbf16> to vector<128x128xbf16>
    %cst_20 = arith.constant dense<0.000000e+00> : vector<16x128xf32>
    %27 = tpu.matmul %24, %26, %cst_20 {dimension_numbers = #tpu.dot_dimension_numbers<[1], [0], [0], [1], [0, 0, 1, 1], [], []>} : vector<16x128xbf16>, vector<128x128xbf16>, vector<16x128xf32> -> vector<16x128xf32>
    %cst_21 = arith.constant 0.000000e+00 : f32
    %28 = vector.broadcast %cst_21 : f32 to vector<16x128xf32>
    %29 = arith.maximumf %27, %28 : vector<16x128xf32>
    %30 = vector.extract_strided_slice %10 {offsets = [32, 0], sizes = [16, 128], strides = [1, 1]} : vector<64x128xf32> to vector<16x128xf32>
    %31 = arith.addf %30, %12 : vector<16x128xf32>
    %cst_22 = arith.constant 5.000000e-01 : f32
    %32 = vector.broadcast %cst_22 : f32 to vector<16x128xf32>
    %33 = arith.mulf %32, %31 : vector<16x128xf32>
    %34 = arith.truncf %33 : vector<16x128xf32> to vector<16x128xbf16>
    %c2 = arith.constant 2 : index
    %c0_23 = arith.constant 0 : index
    %c0_24 = arith.constant 0 : index
    %35 = vector.load %arg5[%c2, %c0_23, %c0_24] : memref<4x128x128xbf16, #tpu.memory_space<vmem>>, vector<1x128x128xbf16>
    %36 = vector.shape_cast %35 : vector<1x128x128xbf16> to vector<128x128xbf16>
    %cst_25 = arith.constant dense<0.000000e+00> : vector<16x128xf32>
    %37 = tpu.matmul %34, %36, %cst_25 {dimension_numbers = #tpu.dot_dimension_numbers<[1], [0], [0], [1], [0, 0, 1, 1], [], []>} : vector<16x128xbf16>, vector<128x128xbf16>, vector<16x128xf32> -> vector<16x128xf32>
    %cst_26 = arith.constant 0.000000e+00 : f32
    %38 = vector.broadcast %cst_26 : f32 to vector<16x128xf32>
    %39 = arith.maximumf %37, %38 : vector<16x128xf32>
    %40 = vector.extract_strided_slice %10 {offsets = [48, 0], sizes = [16, 128], strides = [1, 1]} : vector<64x128xf32> to vector<16x128xf32>
    %41 = arith.truncf %40 : vector<16x128xf32> to vector<16x128xbf16>
    %c3 = arith.constant 3 : index
    %c0_27 = arith.constant 0 : index
    %c0_28 = arith.constant 0 : index
    %42 = vector.load %arg5[%c3, %c0_27, %c0_28] : memref<4x128x128xbf16, #tpu.memory_space<vmem>>, vector<1x128x128xbf16>
    %43 = vector.shape_cast %42 : vector<1x128x128xbf16> to vector<128x128xbf16>
    %cst_29 = arith.constant dense<0.000000e+00> : vector<16x128xf32>
    %44 = tpu.matmul %41, %43, %cst_29 {dimension_numbers = #tpu.dot_dimension_numbers<[1], [0], [0], [1], [0, 0, 1, 1], [], []>} : vector<16x128xbf16>, vector<128x128xbf16>, vector<16x128xf32> -> vector<16x128xf32>
    %cst_30 = arith.constant 0.000000e+00 : f32
    %45 = vector.broadcast %cst_30 : f32 to vector<16x128xf32>
    %46 = arith.maximumf %44, %45 : vector<16x128xf32>
    %47 = tpu.concatenate %19, %29, %39, %46 in 0 : vector<16x128xf32>, vector<16x128xf32>, vector<16x128xf32>, vector<16x128xf32> -> vector<64x128xf32>
    %48 = arith.truncf %47 : vector<64x128xf32> to vector<64x128xbf16>
    %c0_31 = arith.constant 0 : index
    %c0_32 = arith.constant 0 : index
    %49 = vector.load %arg6[%c0_31, %c0_32] : memref<128x128xbf16, #tpu.memory_space<vmem>>, vector<128x128xbf16>
    %c0_33 = arith.constant 0 : index
    %c0_34 = arith.constant 0 : index
    %50 = vector.load %arg7[%c0_33, %c0_34] : memref<1x128xf32, #tpu.memory_space<vmem>>, vector<1x128xf32>
    %c0_35 = arith.constant 0 : index
    %c0_36 = arith.constant 0 : index
    %51 = vector.load %arg8[%c0_35, %c0_36] : memref<1x128xf32, #tpu.memory_space<vmem>>, vector<1x128xf32>
    %cst_37 = arith.constant dense<0.000000e+00> : vector<64x128xf32>
    %52 = tpu.matmul %48, %49, %cst_37 {dimension_numbers = #tpu.dot_dimension_numbers<[1], [0], [0], [1], [0, 0, 1, 1], [], []>} : vector<64x128xbf16>, vector<128x128xbf16>, vector<64x128xf32> -> vector<64x128xf32>
    %53 = vector.broadcast %50 : vector<1x128xf32> to vector<64x128xf32>
    %54 = arith.addf %52, %53 : vector<64x128xf32>
    %55 = math.tanh %54 : vector<64x128xf32>
    %56 = vector.broadcast %51 : vector<1x128xf32> to vector<64x128xf32>
    %57 = arith.mulf %55, %56 : vector<64x128xf32>
    %cst_38 = arith.constant dense<0.000000e+00> : vector<64xf32>
    %58 = vector.multi_reduction <add>, %57, %cst_38 [1] : vector<64x128xf32> to vector<64xf32>
    %59 = vector.shape_cast %58 : vector<64xf32> to vector<64x1xf32>
    %60 = vector.extract_strided_slice %59 {offsets = [0, 0], sizes = [16, 1], strides = [1, 1]} : vector<64x1xf32> to vector<16x1xf32>
    %61 = vector.shape_cast %60 : vector<16x1xf32> to vector<1x16x1xf32>
    %cst_39 = arith.constant dense<0.000000e+00> : vector<1xf32>
    %62 = vector.multi_reduction <add>, %61, %cst_39 [1, 2] : vector<1x16x1xf32> to vector<1xf32>
    %63 = vector.shape_cast %62 : vector<1xf32> to vector<1x1x1xf32>
    %64 = vector.extract %63[0, 0, 0] : f32 from vector<1x1x1xf32>
    %65 = vector.broadcast %64 : f32 to vector<1x1xf32>
    %cst_40 = arith.constant 6.250000e-02 : f32
    %66 = vector.broadcast %cst_40 : f32 to vector<1x1xf32>
    %67 = arith.mulf %65, %66 : vector<1x1xf32>
    %68 = vector.extract_strided_slice %59 {offsets = [16, 0], sizes = [16, 1], strides = [1, 1]} : vector<64x1xf32> to vector<16x1xf32>
    %69 = vector.shape_cast %68 : vector<16x1xf32> to vector<1x16x1xf32>
    %cst_41 = arith.constant dense<0.000000e+00> : vector<1xf32>
    %70 = vector.multi_reduction <add>, %69, %cst_41 [1, 2] : vector<1x16x1xf32> to vector<1xf32>
    %71 = vector.shape_cast %70 : vector<1xf32> to vector<1x1x1xf32>
    %72 = vector.extract %71[0, 0, 0] : f32 from vector<1x1x1xf32>
    %73 = vector.broadcast %72 : f32 to vector<1x1xf32>
    %cst_42 = arith.constant 6.250000e-02 : f32
    %74 = vector.broadcast %cst_42 : f32 to vector<1x1xf32>
    %75 = arith.mulf %73, %74 : vector<1x1xf32>
    %76 = arith.maximumf %67, %75 : vector<1x1xf32>
    %77 = arith.subf %67, %76 : vector<1x1xf32>
    %78 = math.exp %77 : vector<1x1xf32>
    %79 = arith.subf %75, %76 : vector<1x1xf32>
    %80 = math.exp %79 : vector<1x1xf32>
    %81 = arith.addf %78, %80 : vector<1x1xf32>
    %82 = tpu.reciprocal %81 {approx = true} : vector<1x1xf32> -> vector<1x1xf32>
    %83 = arith.mulf %78, %82 : vector<1x1xf32>
    %84 = vector.extract_strided_slice %47 {offsets = [0, 0], sizes = [16, 128], strides = [1, 1]} : vector<64x128xf32> to vector<16x128xf32>
    %85 = vector.broadcast %83 : vector<1x1xf32> to vector<16x128xf32>
    %86 = arith.mulf %85, %84 : vector<16x128xf32>
    %87 = arith.mulf %80, %82 : vector<1x1xf32>
    %88 = vector.extract_strided_slice %47 {offsets = [16, 0], sizes = [16, 128], strides = [1, 1]} : vector<64x128xf32> to vector<16x128xf32>
    %89 = vector.broadcast %87 : vector<1x1xf32> to vector<16x128xf32>
    %90 = arith.mulf %89, %88 : vector<16x128xf32>
    %91 = arith.addf %86, %90 : vector<16x128xf32>
    %92 = vector.extract_strided_slice %59 {offsets = [32, 0], sizes = [16, 1], strides = [1, 1]} : vector<64x1xf32> to vector<16x1xf32>
    %93 = vector.shape_cast %92 : vector<16x1xf32> to vector<1x16x1xf32>
    %cst_43 = arith.constant dense<0.000000e+00> : vector<1xf32>
    %94 = vector.multi_reduction <add>, %93, %cst_43 [1, 2] : vector<1x16x1xf32> to vector<1xf32>
    %95 = vector.shape_cast %94 : vector<1xf32> to vector<1x1x1xf32>
    %96 = vector.extract %95[0, 0, 0] : f32 from vector<1x1x1xf32>
    %97 = vector.broadcast %96 : f32 to vector<1x1xf32>
    %cst_44 = arith.constant 6.250000e-02 : f32
    %98 = vector.broadcast %cst_44 : f32 to vector<1x1xf32>
    %99 = arith.mulf %97, %98 : vector<1x1xf32>
    %100 = vector.extract_strided_slice %59 {offsets = [48, 0], sizes = [16, 1], strides = [1, 1]} : vector<64x1xf32> to vector<16x1xf32>
    %101 = vector.shape_cast %100 : vector<16x1xf32> to vector<1x16x1xf32>
    %cst_45 = arith.constant dense<0.000000e+00> : vector<1xf32>
    %102 = vector.multi_reduction <add>, %101, %cst_45 [1, 2] : vector<1x16x1xf32> to vector<1xf32>
    %103 = vector.shape_cast %102 : vector<1xf32> to vector<1x1x1xf32>
    %104 = vector.extract %103[0, 0, 0] : f32 from vector<1x1x1xf32>
    %105 = vector.broadcast %104 : f32 to vector<1x1xf32>
    %cst_46 = arith.constant 6.250000e-02 : f32
    %106 = vector.broadcast %cst_46 : f32 to vector<1x1xf32>
    %107 = arith.mulf %105, %106 : vector<1x1xf32>
    %108 = arith.maximumf %99, %107 : vector<1x1xf32>
    %109 = arith.subf %99, %108 : vector<1x1xf32>
    %110 = math.exp %109 : vector<1x1xf32>
    %111 = arith.subf %107, %108 : vector<1x1xf32>
    %112 = math.exp %111 : vector<1x1xf32>
    %113 = arith.addf %110, %112 : vector<1x1xf32>
    %114 = tpu.reciprocal %113 {approx = true} : vector<1x1xf32> -> vector<1x1xf32>
    %115 = arith.mulf %110, %114 : vector<1x1xf32>
    %116 = vector.extract_strided_slice %47 {offsets = [32, 0], sizes = [16, 128], strides = [1, 1]} : vector<64x128xf32> to vector<16x128xf32>
    %117 = vector.broadcast %115 : vector<1x1xf32> to vector<16x128xf32>
    %118 = arith.mulf %117, %116 : vector<16x128xf32>
    %119 = arith.mulf %112, %114 : vector<1x1xf32>
    %120 = vector.extract_strided_slice %47 {offsets = [48, 0], sizes = [16, 128], strides = [1, 1]} : vector<64x128xf32> to vector<16x128xf32>
    %121 = vector.broadcast %119 : vector<1x1xf32> to vector<16x128xf32>
    %122 = arith.mulf %121, %120 : vector<16x128xf32>
    %123 = arith.addf %118, %122 : vector<16x128xf32>
    %124 = arith.truncf %91 : vector<16x128xf32> to vector<16x128xbf16>
    %cst_47 = arith.constant dense<0.000000e+00> : vector<16x128xf32>
    %125 = tpu.matmul %124, %49, %cst_47 {dimension_numbers = #tpu.dot_dimension_numbers<[1], [0], [0], [1], [0, 0, 1, 1], [], []>} : vector<16x128xbf16>, vector<128x128xbf16>, vector<16x128xf32> -> vector<16x128xf32>
    %126 = vector.broadcast %50 : vector<1x128xf32> to vector<16x128xf32>
    %127 = arith.addf %125, %126 : vector<16x128xf32>
    %128 = math.tanh %127 : vector<16x128xf32>
    %129 = vector.broadcast %51 : vector<1x128xf32> to vector<16x128xf32>
    %130 = arith.mulf %128, %129 : vector<16x128xf32>
    %cst_48 = arith.constant dense<0.000000e+00> : vector<16xf32>
    %131 = vector.multi_reduction <add>, %130, %cst_48 [1] : vector<16x128xf32> to vector<16xf32>
    %132 = vector.shape_cast %131 : vector<16xf32> to vector<16x1xf32>
    %133 = vector.shape_cast %132 : vector<16x1xf32> to vector<1x16x1xf32>
    %cst_49 = arith.constant dense<0.000000e+00> : vector<1xf32>
    %134 = vector.multi_reduction <add>, %133, %cst_49 [1, 2] : vector<1x16x1xf32> to vector<1xf32>
    %135 = vector.shape_cast %134 : vector<1xf32> to vector<1x1x1xf32>
    %136 = vector.extract %135[0, 0, 0] : f32 from vector<1x1x1xf32>
    %137 = vector.broadcast %136 : f32 to vector<1x1xf32>
    %cst_50 = arith.constant 6.250000e-02 : f32
    %138 = vector.broadcast %cst_50 : f32 to vector<1x1xf32>
    %139 = arith.mulf %137, %138 : vector<1x1xf32>
    %140 = arith.truncf %123 : vector<16x128xf32> to vector<16x128xbf16>
    %cst_51 = arith.constant dense<0.000000e+00> : vector<16x128xf32>
    %141 = tpu.matmul %140, %49, %cst_51 {dimension_numbers = #tpu.dot_dimension_numbers<[1], [0], [0], [1], [0, 0, 1, 1], [], []>} : vector<16x128xbf16>, vector<128x128xbf16>, vector<16x128xf32> -> vector<16x128xf32>
    %142 = vector.broadcast %50 : vector<1x128xf32> to vector<16x128xf32>
    %143 = arith.addf %141, %142 : vector<16x128xf32>
    %144 = math.tanh %143 : vector<16x128xf32>
    %145 = vector.broadcast %51 : vector<1x128xf32> to vector<16x128xf32>
    %146 = arith.mulf %144, %145 : vector<16x128xf32>
    %cst_52 = arith.constant dense<0.000000e+00> : vector<16xf32>
    %147 = vector.multi_reduction <add>, %146, %cst_52 [1] : vector<16x128xf32> to vector<16xf32>
    %148 = vector.shape_cast %147 : vector<16xf32> to vector<16x1xf32>
    %149 = vector.shape_cast %148 : vector<16x1xf32> to vector<1x16x1xf32>
    %cst_53 = arith.constant dense<0.000000e+00> : vector<1xf32>
    %150 = vector.multi_reduction <add>, %149, %cst_53 [1, 2] : vector<1x16x1xf32> to vector<1xf32>
    %151 = vector.shape_cast %150 : vector<1xf32> to vector<1x1x1xf32>
    %152 = vector.extract %151[0, 0, 0] : f32 from vector<1x1x1xf32>
    %153 = vector.broadcast %152 : f32 to vector<1x1xf32>
    %cst_54 = arith.constant 6.250000e-02 : f32
    %154 = vector.broadcast %cst_54 : f32 to vector<1x1xf32>
    %155 = arith.mulf %153, %154 : vector<1x1xf32>
    %156 = arith.maximumf %139, %155 : vector<1x1xf32>
    %157 = arith.subf %139, %156 : vector<1x1xf32>
    %158 = math.exp %157 : vector<1x1xf32>
    %159 = arith.subf %155, %156 : vector<1x1xf32>
    %160 = math.exp %159 : vector<1x1xf32>
    %161 = arith.addf %158, %160 : vector<1x1xf32>
    %162 = tpu.reciprocal %161 {approx = true} : vector<1x1xf32> -> vector<1x1xf32>
    %163 = arith.mulf %158, %162 : vector<1x1xf32>
    %164 = vector.broadcast %163 : vector<1x1xf32> to vector<16x128xf32>
    %165 = arith.mulf %164, %91 : vector<16x128xf32>
    %166 = arith.mulf %160, %162 : vector<1x1xf32>
    %167 = vector.broadcast %166 : vector<1x1xf32> to vector<16x128xf32>
    %168 = arith.mulf %167, %123 : vector<16x128xf32>
    %169 = arith.addf %165, %168 : vector<16x128xf32>
    %c0_55 = arith.constant 0 : index
    %c0_56 = arith.constant 0 : index
    %170 = vector.load %arg12[%c0_55, %c0_56] : memref<16x128xf32, #tpu.memory_space<vmem>>, vector<16x128xf32>
    tpu.vector_store %arg12[%c0_55, %c0_56], %169 {strides = array<i32>} : memref<16x128xf32, #tpu.memory_space<vmem>>, vector<16x128xf32>,
    %171 = arith.truncf %169 : vector<16x128xf32> to vector<16x128xbf16>
    %c0_57 = arith.constant 0 : index
    %c0_58 = arith.constant 0 : index
    %172 = vector.load %arg9[%c0_57, %c0_58] : memref<128x128xbf16, #tpu.memory_space<vmem>>, vector<128x128xbf16>
    %cst_59 = arith.constant dense<0.000000e+00> : vector<16x128xf32>
    %173 = tpu.matmul %171, %172, %cst_59 {dimension_numbers = #tpu.dot_dimension_numbers<[1], [0], [0], [1], [0, 0, 1, 1], [], []>} : vector<16x128xbf16>, vector<128x128xbf16>, vector<16x128xf32> -> vector<16x128xf32>
    %c0_60 = arith.constant 0 : index
    %c0_61 = arith.constant 0 : index
    %174 = vector.load %arg10[%c0_60, %c0_61] : memref<1x128xf32, #tpu.memory_space<vmem>>, vector<1x128xf32>
    %175 = vector.broadcast %174 : vector<1x128xf32> to vector<16x128xf32>
    %176 = arith.addf %173, %175 : vector<16x128xf32>
    %c0_62 = arith.constant 0 : index
    %c0_63 = arith.constant 0 : index
    %177 = vector.load %arg11[%c0_62, %c0_63] : memref<16x128xf32, #tpu.memory_space<vmem>>, vector<16x128xf32>
    tpu.vector_store %arg11[%c0_62, %c0_63], %176 {strides = array<i32>} : memref<16x128xf32, #tpu.memory_space<vmem>>, vector<16x128xf32>,
    return
  }
}

</mosaic_0001>

<bundles_post_ra>
// kernel: tpu_custom_call.1
= control target key start
LH: loop header
LB: loop body
LE: loop exit
PB: predicated region body
PF: predicated region fallthrough
CT: control target
= control target key end

     0   :  { %18 = vsyncpa [#allocation3], 0  ;;  %s1725_s0 = inlined_call_operand.vmem [shape: bf16[16,20], index: 0, kind: input, shape index: {}]   ;;  %s1726_s1 = inlined_call_operand.vmem [shape: bf16[20,128], index: 1, kind: input, shape index: {}]   ;;  %s1727_s2 = inlined_call_operand.vmem [shape: f32[1,128], index: 2, kind: input, shape index: {}]   ;;  %s1728_s3 = inlined_call_operand.vmem [shape: bf16[64,16], index: 3, kind: input, shape index: {}]   ;;  %s1729_s4 = inlined_call_operand.vmem [shape: bf16[16,16], index: 4, kind: input, shape index: {}]   ;;  %s1730_s5 = inlined_call_operand.hbm [shape: bf16[4,128,128], index: 5, kind: input, shape index: {}]   ;;  %s1731_s6 = inlined_call_operand.hbm [shape: bf16[128,128], index: 6, kind: input, shape index: {}]   ;;  %s1732_s7 = inlined_call_operand.vmem [shape: f32[1,128], index: 7, kind: input, shape index: {}]   ;;  %s1733_s8 = inlined_call_operand.vmem [shape: f32[1,128], index: 8, kind: input, shape index: {}]   ;;  %s1734_s9 = inlined_call_operand.hbm [shape: bf16[128,128], index: 9, kind: input, shape index: {}]   ;;  %s1735_s10 = inlined_call_operand.vmem [shape: f32[1,128], index: 10, kind: input, shape index: {}]   ;;  %s1736_s11 = inlined_call_operand.hbm [shape: f32[16,128], index: 11, kind: output, shape index: {0}]   ;;  %s1737_s12 = inlined_call_operand.hbm [shape: f32[16,128], index: 12, kind: output, shape index: {1}]  }
   0x1   :  { %19 = vsyncpa [#allocation6], 0 }
   0x2   :  { %20 = vsyncpa [#allocation4], 0 }
   0x3   :  { %21 = vsyncpa [#allocation10], 0  ;;  %s49_s23 = sshll.u32 %s1731_s6, 4  ;;  %s1488_s24 = smov [#allocation5]   ;;  %s50_s23 = int_to_ptr.hbm [resolvable:$true] %s49_s23 }
   0x4   :  { %s51_s25 = sshll.u32 %s1488_s24, 4  ;;  %s36_s28 = sshll.u32 %s1730_s5, 4  ;;  %s52_s25 = int_to_ptr.vmem [resolvable:$true] %s51_s25  ;;  %s37_s28 = int_to_ptr.hbm [resolvable:$true] %s36_s28 }
   0x5   :  { %s1489_s29 = smov 64   ;;  %s1490_s30 = smov 4  }
   0x6   :  { %57 = dma.hbm_to_vmem [thread:$0]  %s50_s23, 1024, %s52_s25, [#allocation6], %s1489_s29, %s1489_s29, %s1490_s30  }
   0x7   :  { %s1491_s13 = smov [#allocation2]   ;;  %s66_s17 = sshll.u32 %s1734_s9, 4  ;;  %s67_s17 = int_to_ptr.hbm [resolvable:$true] %s66_s17 }
   0x8   :  { %s38_s14 = sshll.u32 %s1491_s13, 4  ;;  %s1492_s6 = smov [#allocation7]   ;;  %s39_s14 = int_to_ptr.vmem [resolvable:$true] %s38_s14 }
   0x9   :  { %44 = dma.hbm_to_vmem [thread:$0]  %s37_s28, 4096, %s39_s14, [#allocation3], %s1489_s29, %s1489_s29, %s1490_s30  }
   0xa   :  { %s68_s18 = sshll.u32 %s1492_s6, 4  ;;  %s69_s18 = int_to_ptr.vmem [resolvable:$true] %s68_s18 }
   0xb   :  { %74 = dma.hbm_to_vmem [thread:$0]  %s67_s17, 1024, %s69_s18, [#allocation6], %s1489_s29, %s1489_s29, %s1490_s30  }
   0xc   :  { %1480 = dma.done.wait [#allocation3], 4096  }
   0xd   :  { %1481 = vsyncadd [#allocation3], 4294963200 }
   0xe   :  { %1482 = dma.done.wait [#allocation6], 2048  }
   0xf   :  { %1483 = vsyncadd [#allocation6], 4294965248  ;;  %v94_v0 = vld [vmem:[%s1726_s1 + $0x8] sm:$0x3]  ;;  %vm117_vm0 = vcmask 1041408   ;;  %v1238_v4 = vld [vmem:[%s1726_s1] sm:$0xff] }
  0x10   :  { %v109_v1 = vunpack.c.l.b16 %v94_v0  ;;  %v1237_v5 = vld [vmem:[%s1725_s0] sm:$0xff]  ;;  %vm113_vm1 = vcmask 162816   ;;  %v1251_v7 = vld [vmem:[#allocation2 + $0x38] sm:$0xff]  ;;  %v1250_v9 = vld [vmem:[#allocation2 + $0x30] sm:$0xff]  ;;  %vm166_vm2 = vcmask 130048   ;;  %vm704_vm3 = vcmask 7168  }
  0x11   :  { %v1314_v8 = vld [vmem:[%s1727_s2] ss:$0 sm:$0xff]  ;;  %297 = vmatpush.bf16.msra.mxu3 %v1251_v7  ;;  %v1249_v12 = vld [vmem:[#allocation2 + $0x28] sm:$0xff]  ;;  %v1267_v18 = vld [vmem:[#allocation2 + $0xb8] sm:$0xff]  ;;  %s1493_s5 = smov [#allocation9]   ;;  %s992_s21 = sshll.u32 %s1737_s12, 4  ;;  %s993_s21 = int_to_ptr.hbm [resolvable:$true] %s992_s21 }
  0x12   :  { %v111_v2 = vpack.c.b16 %v109_v1, %v109_v1  ;;  %v1248_v16 = vld [vmem:[#allocation2 + $0x20] sm:$0xff]  ;;  %v1241_v20 = vld [vmem:[%s1728_s3 + $0x10] sm:$0xff]  ;;  %v1247_v22 = vld [vmem:[#allocation2 + $0x18] sm:$0xff]  ;;  %s990_s19 = sshll.u32 %s1493_s5, 4  ;;  %s1494_s22 = smov 128   ;;  %s991_s19 = int_to_ptr.vmem [resolvable:$true] %s990_s19 }
  0x13   :  { %v1239_v19 = vld [vmem:[%s1728_s3] sm:$0xff]  ;;  %v1240_v23 = vld [vmem:[%s1728_s3 + $0x8] sm:$0xff]  ;;  %v1242_v24 = vld [vmem:[%s1728_s3 + $0x18] sm:$0xff]  ;;  %s1495_s23 = smov 8   ;;  %s1496_s1 = smov [#allocation8]  }
  0x14   :  { %v119_v3 = vsel %vm117_vm0, %v111_v2, 0  ;;  %v1243_v21 = vld [vmem:[%s1729_s4] sm:$0xff]  ;;  %v1266_v25 = vld [vmem:[#allocation2 + $0xb0] sm:$0xff]  ;;  %v1265_v26 = vld [vmem:[#allocation2 + $0xa8] sm:$0xff]  ;;  %s977_s25 = sshll.u32 %s1496_s1, 4  ;;  %s979_s27 = sshll.u32 %s1736_s11, 4  ;;  %s978_s25 = int_to_ptr.vmem [resolvable:$true] %s977_s25  ;;  %s980_s27 = int_to_ptr.hbm [resolvable:$true] %s979_s27 }
  0x15   :  { %127 = vmatpush.bf16.msra.mxu0 %v119_v3  ;;  %298 = vmatpush.bf16.msra.mxu3 %v1250_v9  ;;  %v1246_v27 = vld [vmem:[#allocation2 + $0x10] sm:$0xff]  ;;  %v1259_v28 = vld [vmem:[#allocation2 + $0x78] sm:$0xff]  ;;  %v1245_v29 = vld [vmem:[#allocation2 + $0x8] sm:$0xff] }
  0x16   :  { %v1258_v30 = vld [vmem:[#allocation2 + $0x70] sm:$0xff]  ;;  %v1264_v31 = vld [vmem:[#allocation2 + $0xa0] sm:$0xff]  ;;  %v1263_v32 = vld [vmem:[#allocation2 + $0x98] sm:$0xff] }
  0x17   :  { %v1244_v33 = vld [vmem:[#allocation2] sm:$0xff]  ;;  %v1257_v34 = vld [vmem:[#allocation2 + $0x68] sm:$0xff]  ;;  %v1262_v35 = vld [vmem:[#allocation2 + $0x90] sm:$0xff] }
  0x18   :  { %v1256_v36 = vld [vmem:[#allocation2 + $0x60] sm:$0xff]  ;;  %v1261_v37 = vld [vmem:[#allocation2 + $0x88] sm:$0xff]  ;;  %v1255_v38 = vld [vmem:[#allocation2 + $0x58] sm:$0xff] }
  0x19   :  { %128 = vmatpush.bf16.msra.mxu0 %v1238_v4  ;;  %299 = vmatpush.bf16.msra.mxu3 %v1249_v12  ;;  %v1275_v39 = vld [vmem:[#allocation2 + $0xf8] sm:$0xff]  ;;  %v1260_v40 = vld [vmem:[#allocation2 + $0x80] sm:$0xff]  ;;  %v1254_v41 = vld [vmem:[#allocation2 + $0x50] sm:$0xff] }
  0x1a   :  { %v1274_v42 = vld [vmem:[#allocation2 + $0xf0] sm:$0xff]  ;;  %v1253_v43 = vld [vmem:[#allocation2 + $0x48] sm:$0xff]  ;;  %v1252_v45 = vld [vmem:[#allocation2 + $0x40] sm:$0xff] }
  0x1b   :  { %v1273_v44 = vld [vmem:[#allocation2 + $0xe8] sm:$0xff]  ;;  %v1272_v46 = vld [vmem:[#allocation2 + $0xe0] sm:$0xff]  ;;  %v1271_v47 = vld [vmem:[#allocation2 + $0xd8] sm:$0xff] }
  0x1c   :  { %1019 = vmatmul.msk.bf16.vlgmr.msra.gmra.mxu0 %vm113_vm1, %v1237_v5  ;;  %v1283_v50 = vld [vmem:[#allocation5 + $0x38] sm:$0xff]  ;;  %v1270_v51 = vld [vmem:[#allocation2 + $0xd0] sm:$0xff]  ;;  %v1269_v53 = vld [vmem:[#allocation2 + $0xc8] sm:$0xff] }
  0x1d   :  { %300 = vmatpush.bf16.msra.mxu3 %v1248_v16  ;;  %v1282_v52 = vld [vmem:[#allocation5 + $0x30] sm:$0xff]  ;;  %v1281_v54 = vld [vmem:[#allocation5 + $0x28] sm:$0xff]  ;;  %v1268_v59 = vld [vmem:[#allocation2 + $0xc0] sm:$0xff] }
  0x1e   :  { %v1280_v60 = vld [vmem:[#allocation5 + $0x20] sm:$0xff]  ;;  %v1279_v62 = vld [vmem:[#allocation5 + $0x18] sm:$0xff] }
  0x1f   :  { %v1276_v16 = vld [vmem:[#allocation5] sm:$0xff] }
  0x21   :  { %301 = vmatpush.bf16.msra.mxu3 %v1247_v22 }
  0x25   :  { %302 = vmatpush.bf16.msra.mxu3 %v1246_v27 }
  0x29   :  { %303 = vmatpush.bf16.msra.mxu3 %v1245_v29 }
  0x2d   :  { %304 = vmatpush.bf16.msra.mxu3 %v1244_v33 }
  0x31   :  { %551 = vmatpush.bf16.msrb.mxu3 %v1275_v39 }
  0x35   :  { %552 = vmatpush.bf16.msrb.mxu3 %v1274_v42 }
  0x39   :  { %553 = vmatpush.bf16.msrb.mxu3 %v1273_v44 }
  0x3d   :  { %554 = vmatpush.bf16.msrb.mxu3 %v1272_v46 }
  0x41   :  { %555 = vmatpush.bf16.msrb.mxu3 %v1271_v47 }
  0x45   :  { %556 = vmatpush.bf16.msrb.mxu3 %v1270_v51 }
  0x49   :  { %557 = vmatpush.bf16.msrb.mxu3 %v1269_v53 }
  0x4d   :  { %558 = vmatpush.bf16.msrb.mxu3 %v1268_v59 }
  0x99   :  { %v130_v6 = vpop.f32.mrf.mxu0 }
  0x9a   :  { %v131_v10 = vadd.f32 %v1314_v8, %v130_v6 }
  0x9c   :  { %v135_v14 = vmax.f32 %v131_v10, 0.0 }
  0xa1   :  { %v132_v11 = vpop.f32.mrf.mxu0 }
  0xa2   :  { %v133_v13 = vadd.f32 %v1314_v8, %v132_v11 }
  0xa4   :  { %v136_v15 = vmax.f32 %v133_v13, 0.0 }
  0xa6   :  { %v137_v17 = vpack.c.bf16 %v136_v15, %v135_v14  ;;  %v1278_v14 = vld [vmem:[#allocation5 + $0x10] sm:$0xff]  ;;  %v1277_v15 = vld [vmem:[#allocation5 + $0x8] sm:$0xff] }
  0xa8   :  { %186 = vmatpush.bf16.msrb.mxu0 %v137_v17  ;;  %1292 = vmatpush.bf16.msra.mxu1 %v137_v17 }
  0xa9   :  { %225 = vmatpush.bf16.msra.mxu2 %v137_v17 }
  0xab   :  { %1036 = vmatmul.msk.bf16.vlgmr.msrb.gmra.mxu0 %vm166_vm2, %v1239_v19  ;;  %1038 = vmatmul.msk.bf16.vlgmr.msra.gmra.mxu1 %vm166_vm2, %v1241_v20 }
  0xac   :  { %469 = vmatpush.bf16.msra.mxu0 %v1267_v18  ;;  %1044 = vmatmul.msk.bf16.vlgmr.msra.gmra.mxu2 %vm166_vm2, %v1243_v21 }
  0xad   :  { %383 = vmatpush.bf16.msrb.mxu2 %v1259_v28  ;;  %640 = vmatpush.bf16.msrb.mxu1 %v1283_v50 }
  0xb0   :  { %470 = vmatpush.bf16.msra.mxu0 %v1266_v25 }
  0xb1   :  { %384 = vmatpush.bf16.msrb.mxu2 %v1258_v30  ;;  %641 = vmatpush.bf16.msrb.mxu1 %v1282_v52 }
  0xb4   :  { %471 = vmatpush.bf16.msra.mxu0 %v1265_v26 }
  0xb5   :  { %385 = vmatpush.bf16.msrb.mxu2 %v1257_v34  ;;  %642 = vmatpush.bf16.msrb.mxu1 %v1281_v54 }
  0xb8   :  { %472 = vmatpush.bf16.msra.mxu0 %v1264_v31 }
  0xb9   :  { %386 = vmatpush.bf16.msrb.mxu2 %v1256_v36  ;;  %643 = vmatpush.bf16.msrb.mxu1 %v1280_v60 }
  0xbb   :  { %1037 = vmatmul.msk.bf16.gmra.mxu0 %vm166_vm2, %v1240_v23  ;;  %1039 = vmatmul.msk.bf16.gmra.mxu1 %vm166_vm2, %v1242_v24 }
  0xbc   :  { %473 = vmatpush.bf16.msra.mxu0 %v1263_v32 }
  0xbd   :  { %387 = vmatpush.bf16.msrb.mxu2 %v1255_v38  ;;  %644 = vmatpush.bf16.msrb.mxu1 %v1279_v62 }
  0xc0   :  { %474 = vmatpush.bf16.msra.mxu0 %v1262_v35 }
  0xc1   :  { %388 = vmatpush.bf16.msrb.mxu2 %v1254_v41  ;;  %645 = vmatpush.bf16.msrb.mxu1 %v1278_v14 }
  0xc4   :  { %475 = vmatpush.bf16.msra.mxu0 %v1261_v37  ;;  %v1641_v37 = vld [vmem:[%s1732_s7] ss:$0 sm:$0xff] }
  0xc5   :  { %389 = vmatpush.bf16.msrb.mxu2 %v1253_v43  ;;  %646 = vmatpush.bf16.msrb.mxu1 %v1277_v15 }
  0xc8   :  { %476 = vmatpush.bf16.msra.mxu0 %v1260_v40  ;;  %v1647_v40 = vld [vmem:[%s1733_s8] ss:$0 sm:$0xff] }
  0xc9   :  { %390 = vmatpush.bf16.msrb.mxu2 %v1252_v45  ;;  %647 = vmatpush.bf16.msrb.mxu1 %v1276_v16 }
  0xcc   :  { %833 = vmatpush.bf16.msrb.mxu0 %v1283_v50 }
  0xcd   :  { %796 = vmatpush.bf16.msra.mxu2 %v1283_v50 }
  0xd0   :  { %834 = vmatpush.bf16.msrb.mxu0 %v1282_v52 }
  0xd1   :  { %797 = vmatpush.bf16.msra.mxu2 %v1282_v52 }
  0xd4   :  { %835 = vmatpush.bf16.msrb.mxu0 %v1281_v54 }
  0xd5   :  { %798 = vmatpush.bf16.msra.mxu2 %v1281_v54 }
  0xd8   :  { %836 = vmatpush.bf16.msrb.mxu0 %v1280_v60 }
  0xd9   :  { %799 = vmatpush.bf16.msra.mxu2 %v1280_v60 }
  0xdc   :  { %837 = vmatpush.bf16.msrb.mxu0 %v1279_v62 }
  0xdd   :  { %800 = vmatpush.bf16.msra.mxu2 %v1279_v62 }
  0xe0   :  { %838 = vmatpush.bf16.msrb.mxu0 %v1278_v14 }
  0xe1   :  { %801 = vmatpush.bf16.msra.mxu2 %v1278_v14 }
  0xe4   :  { %839 = vmatpush.bf16.msrb.mxu0 %v1277_v15 }
  0xe5   :  { %802 = vmatpush.bf16.msra.mxu2 %v1277_v15 }
  0xe8   :  { %840 = vmatpush.bf16.msrb.mxu0 %v1276_v16 }
  0xe9   :  { %803 = vmatpush.bf16.msra.mxu2 %v1276_v16 }
 0x128   :  { %v188_v48 = vpop.f32.mrf.mxu0  ;;  %v198_v49 = vpop.f32.mrf.mxu1 }
 0x12f   :  { %v227_v55 = vpop.f32.mrf.mxu2 }
 0x130   :  { %v190_v56 = vpop.f32.mrf.mxu0  ;;  %v200_v57 = vpop.f32.mrf.mxu1  ;;  %v399_v61 = vadd.f32 %v227_v55, %v198_v49 }
 0x131   :  { %v232_v58 = vpack.c.bf16 %v190_v56, %v188_v48 }
 0x132   :  { %v401_v0 = vmul.f32 0.5, %v399_v61 }
 0x133   :  { %305 = vmatmul.bf16.vlgmr.msra.gmra.mxu3 %v232_v58 }
 0x137   :  { %v229_v63 = vpop.f32.mrf.mxu2 }
 0x138   :  { %v193_v1 = vpop.f32.mrf.mxu0  ;;  %v400_v2 = vadd.f32 %v229_v63, %v200_v57  ;;  %v203_v3 = vpop.f32.mrf.mxu1 }
 0x139   :  { %v313_v6 = vadd.f32 %v227_v55, %v193_v1 }
 0x13a   :  { %v402_v4 = vmul.f32 0.5, %v400_v2 }
 0x13b   :  { %v315_v11 = vmul.f32 0.5, %v313_v6 }
 0x13c   :  { %v403_v5 = vpack.c.bf16 %v402_v4, %v401_v0 }
 0x13e   :  { %477 = vmatmul.bf16.vlgmr.msra.gmra.mxu0 %v403_v5 }
 0x140   :  { %v195_v7 = vpop.f32.mrf.mxu0  ;;  %v205_v8 = vpop.f32.mrf.mxu1 }
 0x141   :  { %v314_v9 = vadd.f32 %v229_v63, %v195_v7  ;;  %v485_v10 = vpack.c.bf16 %v205_v8, %v203_v3 }
 0x143   :  { %v316_v12 = vmul.f32 0.5, %v314_v9  ;;  %559 = vmatmul.bf16.vlgmr.msrb.gmra.mxu3 %v485_v10 }
 0x145   :  { %v317_v13 = vpack.c.bf16 %v316_v12, %v315_v11 }
 0x147   :  { %391 = vmatmul.bf16.vlgmr.msrb.gmra.mxu2 %v317_v13 }
 0x1b6   :  { %v1598_v17 = vpop.f32.mrf.mxu3 }
 0x1b7   :  { %v311_v19 = vmax.f32 %v1598_v17, 0.0 }
 0x1bb   :  { %v1614_v26 = vpop.f32.mrf.mxu0 }
 0x1bc   :  { %v483_v30 = vmax.f32 %v1614_v26, 0.0 }
 0x1be   :  { %v1600_v18 = vpop.f32.mrf.mxu3 }
 0x1bf   :  { %v312_v20 = vmax.f32 %v1600_v18, 0.0 }
 0x1c1   :  { %v567_v21 = vpack.c.bf16 %v312_v20, %v311_v19 }
 0x1c3   :  { %648 = vmatmul.bf16.vlgmr.msrb.gmra.mxu1 %v567_v21  ;;  %v1620_v28 = vpop.f32.mrf.mxu0 }
 0x1c4   :  { %v484_v29 = vmax.f32 %v1620_v28, 0.0 }
 0x1c6   :  { %v1624_v31 = vpop.f32.mrf.mxu3  ;;  %v569_v32 = vpack.c.bf16 %v484_v29, %v483_v30 }
 0x1c7   :  { %v565_v34 = vmax.f32 %v1624_v31, 0.0 }
 0x1ca   :  { %v1608_v22 = vpop.f32.mrf.mxu2 }
 0x1cb   :  { %v397_v24 = vmax.f32 %v1608_v22, 0.0 }
 0x1ce   :  { %v1630_v33 = vpop.f32.mrf.mxu3 }
 0x1cf   :  { %v566_v35 = vmax.f32 %v1630_v33, 0.0 }
 0x1d1   :  { %v570_v36 = vpack.c.bf16 %v566_v35, %v565_v34 }
 0x1d2   :  { %v1610_v23 = vpop.f32.mrf.mxu2 }
 0x1d3   :  { %v398_v25 = vmax.f32 %v1610_v23, 0.0 }
 0x1d5   :  { %v568_v27 = vpack.c.bf16 %v398_v25, %v397_v24 }
 0x1d7   :  { %653 = vmatmul.bf16.gmra.mxu1 %v568_v27 }
 0x1e7   :  { %658 = vmatmul.bf16.gmra.mxu1 %v569_v32 }
 0x1f7   :  { %663 = vmatmul.bf16.gmra.mxu1 %v570_v36 }
 0x240   :  { %v649_v38 = vpop.f32.mrf.mxu1 }
 0x241   :  { %v650_v39 = vadd.f32 %v1641_v37, %v649_v38 }
 0x243   :  { %1318 = vtanh.f32 %v650_v39 }
 0x248   :  { %v651_v41 = vpop.f32.mrf.mxu1 }
 0x249   :  { %v1319_v42 = vpop.eup %1318  ;;  %v652_v43 = vadd.f32 %v1641_v37, %v651_v41 }
 0x24a   :  { %v680_v44 = vmul.f32 %v1319_v42, %v1647_v40 }
 0x24b   :  { %1320 = vtanh.f32 %v652_v43 }
 0x24c   :  { %688 = vadd.xlane.f32.xlu0 %v680_v44 }
 0x251   :  { %v1321_v45 = vpop.eup %1320 }
 0x252   :  { %v681_v46 = vmul.f32 %v1321_v45, %v1647_v40 }
 0x254   :  { %690 = vadd.xlane.f32.xlu0 %v681_v46  ;;  %v654_v47 = vpop.f32.mrf.mxu1 }
 0x255   :  { %v655_v48 = vadd.f32 %v1641_v37, %v654_v47 }
 0x257   :  { %1322 = vtanh.f32 %v655_v48 }
 0x25c   :  { %v656_v49 = vpop.f32.mrf.mxu1 }
 0x25d   :  { %v1323_v50 = vpop.eup %1322  ;;  %v657_v51 = vadd.f32 %v1641_v37, %v656_v49 }
 0x25e   :  { %v682_v52 = vmul.f32 %v1323_v50, %v1647_v40 }
 0x25f   :  { %1324 = vtanh.f32 %v657_v51 }
 0x260   :  { %692 = vadd.xlane.f32.xlu1 %v682_v52 }
 0x264   :  { %v659_v53 = vpop.f32.mrf.mxu1 }
 0x265   :  { %v1325_v54 = vpop.eup %1324  ;;  %v660_v55 = vadd.f32 %v1641_v37, %v659_v53 }
 0x266   :  { %v683_v56 = vmul.f32 %v1325_v54, %v1647_v40 }
 0x267   :  { %1326 = vtanh.f32 %v660_v55 }
 0x268   :  { %694 = vadd.xlane.f32.xlu1 %v683_v56 }
 0x26c   :  { %v661_v57 = vpop.f32.mrf.mxu1 }
 0x26d   :  { %v1327_v58 = vpop.eup %1326  ;;  %v662_v59 = vadd.f32 %v1641_v37, %v661_v57 }
 0x26e   :  { %v684_v60 = vmul.f32 %v1327_v58, %v1647_v40 }
 0x26f   :  { %1328 = vtanh.f32 %v662_v59 }
 0x270   :  { %696 = vadd.xlane.f32.xlu2 %v684_v60 }
 0x274   :  { %v664_v61 = vpop.f32.mrf.mxu1 }
 0x275   :  { %v1329_v62 = vpop.eup %1328  ;;  %v665_v63 = vadd.f32 %v1641_v37, %v664_v61 }
 0x276   :  { %v685_v0 = vmul.f32 %v1329_v62, %v1647_v40 }
 0x277   :  { %1330 = vtanh.f32 %v665_v63 }
 0x278   :  { %698 = vadd.xlane.f32.xlu2 %v685_v0 }
 0x27c   :  { %v666_v1 = vpop.f32.mrf.mxu1 }
 0x27d   :  { %v1331_v2 = vpop.eup %1330  ;;  %v667_v3 = vadd.f32 %v1641_v37, %v666_v1 }
 0x27e   :  { %v686_v4 = vmul.f32 %v1331_v2, %v1647_v40 }
 0x27f   :  { %1332 = vtanh.f32 %v667_v3 }
 0x280   :  { %700 = vadd.xlane.f32.xlu0 %v686_v4 }
 0x285   :  { %v1333_v5 = vpop.eup %1332 }
 0x286   :  { %v687_v6 = vmul.f32 %v1333_v5, %v1647_v40 }
 0x288   :  { %702 = vadd.xlane.f32.xlu1 %v687_v6 }
 0x2bf   :  { %v689_v7 = vpop.xlane.xlu0 %688 }
 0x2c0   :  { %v705_v9 = vsel %vm704_vm3, %v689_v7, 0.0 }
 0x2c7   :  { %v691_v8 = vpop.xlane.xlu0 %690 }
 0x2c8   :  { %v706_v10 = vsel %vm704_vm3, %v691_v8, 0.0 }
 0x2c9   :  { %v707_v11 = vadd.f32 %v706_v10, %v705_v9 }
 0x2cb   :  { %708 = vadd.xlane.f32.xlu2 %v707_v11 }
 0x2d3   :  { %v693_v12 = vpop.xlane.xlu1 %692 }
 0x2d4   :  { %v719_v14 = vsel %vm704_vm3, %v693_v12, 0.0 }
 0x2db   :  { %v695_v13 = vpop.xlane.xlu1 %694 }
 0x2dc   :  { %v720_v15 = vsel %vm704_vm3, %v695_v13, 0.0 }
 0x2dd   :  { %v721_v16 = vadd.f32 %v720_v15, %v719_v14 }
 0x2df   :  { %722 = vadd.xlane.f32.xlu0 %v721_v16 }
 0x2e3   :  { %v697_v21 = vpop.xlane.xlu2 %696 }
 0x2e4   :  { %v750_v32 = vsel %vm704_vm3, %v697_v21, 0.0 }
 0x2eb   :  { %v699_v27 = vpop.xlane.xlu2 %698 }
 0x2ec   :  { %v751_v36 = vsel %vm704_vm3, %v699_v27, 0.0 }
 0x2ed   :  { %v752_v38 = vadd.f32 %v751_v36, %v750_v32 }
 0x2ef   :  { %753 = vadd.xlane.f32.xlu1 %v752_v38 }
 0x2f3   :  { %v701_v39 = vpop.xlane.xlu0 %700 }
 0x2f4   :  { %v764_v42 = vsel %vm704_vm3, %v701_v39, 0.0 }
 0x2fb   :  { %v703_v41 = vpop.xlane.xlu1 %702 }
 0x2fc   :  { %v765_v43 = vsel %vm704_vm3, %v703_v41, 0.0 }
 0x2fd   :  { %v766_v44 = vadd.f32 %v765_v43, %v764_v42 }
 0x2ff   :  { %767 = vadd.xlane.f32.xlu2 %v766_v44 }
 0x33e   :  { %v709_v45 = vpop.xlane.xlu2 %708 }
 0x33f   :  { %v710_v46 = vrot.slane %v709_v45, 4 }
 0x341   :  { %v711_v47 = vadd.f32 %v710_v46, %v709_v45 }
 0x343   :  { %v712_v48 = vrot.slane %v711_v47, 2 }
 0x345   :  { %v713_v49 = vadd.f32 %v712_v48, %v711_v47 }
 0x347   :  { %v714_v50 = vrot.slane %v713_v49, 1 }
 0x349   :  { %v715_v51 = vadd.f32 %v714_v50, %v713_v49 }
 0x34b   :  { %1293 = vpush %v715_v51 }
 0x352   :  { %v723_v52 = vpop.xlane.xlu0 %722 }
 0x353   :  { %v724_v53 = vrot.slane %v723_v52, 4 }
 0x355   :  { %v725_v54 = vadd.f32 %v724_v53, %v723_v52 }
 0x357   :  { %v726_v55 = vrot.slane %v725_v54, 2 }
 0x359   :  { %v727_v56 = vadd.f32 %v726_v55, %v725_v54 }
 0x35b   :  { %v728_v57 = vrot.slane %v727_v56, 1 }
 0x35d   :  { %v729_v58 = vadd.f32 %v728_v57, %v727_v56 }
 0x35f   :  { %1295 = vpush %v729_v58 }
 0x362   :  { %v754_v59 = vpop.xlane.xlu1 %753 }
 0x363   :  { %v755_v60 = vrot.slane %v754_v59, 4 }
 0x365   :  { %v756_v61 = vadd.f32 %v755_v60, %v754_v59 }
 0x367   :  { %v757_v62 = vrot.slane %v756_v61, 2 }
 0x369   :  { %v758_v63 = vadd.f32 %v757_v62, %v756_v61 }
 0x36b   :  { %v759_v0 = vrot.slane %v758_v63, 1 }
 0x36d   :  { %v760_v1 = vadd.f32 %v759_v0, %v758_v63 }
 0x36f   :  { %1297 = vpush %v760_v1 }
 0x372   :  { %v768_v2 = vpop.xlane.xlu2 %767 }
 0x373   :  { %v769_v3 = vrot.slane %v768_v2, 4 }
 0x375   :  { %v770_v4 = vadd.f32 %v769_v3, %v768_v2 }
 0x377   :  { %v771_v5 = vrot.slane %v770_v4, 2 }
 0x379   :  { %v772_v6 = vadd.f32 %v771_v5, %v770_v4 }
 0x37b   :  { %v773_v7 = vrot.slane %v772_v6, 1 }
 0x37c   :  { %s1294_s7 = spop %1293 }
 0x37d   :  { %v774_v8 = vadd.f32 %v773_v7, %v772_v6  ;;  %v717_v9 = vstv %s1294_s7 }
 0x37e   :  { %v718_v11 = vmul.f32 0.0625, %v717_v9 }
 0x37f   :  { %1299 = vpush %v774_v8 }
 0x390   :  { %s1296_s8 = spop %1295 }
 0x391   :  { %v731_v10 = vstv %s1296_s8 }
 0x392   :  { %v732_v12 = vmul.f32 0.0625, %v731_v10 }
 0x394   :  { %v733_v13 = vmax.f32 %v718_v11, %v732_v12 }
 0x396   :  { %v734_v14 = vsub.f32 %v718_v11, %v733_v13  ;;  %v737_v15 = vsub.f32 %v732_v12, %v733_v13 }
 0x398   :  { %v735_v16 = vmul.f32 1.442695, %v734_v14  ;;  %v738_v21 = vmul.f32 1.442695, %v737_v15 }
 0x39a   :  { %1334 = vpow2.f32 %v735_v16 }
 0x39b   :  { %1336 = vpow2.f32 %v738_v21 }
 0x3a0   :  { %v1335_v27 = vpop.eup %1334  ;;  %s1298_s16 = spop %1297 }
 0x3a1   :  { %v1337_v32 = vpop.eup %1336  ;;  %v762_v46 = vstv %s1298_s16 }
 0x3a2   :  { %v740_v36 = vadd.f32 %v1337_v32, %v1335_v27 }
 0x3a4   :  { %1338 = vrcp.f32 %v740_v36 }
 0x3aa   :  { %v1339_v38 = vpop.eup %1338 }
 0x3ab   :  { %v742_v39 = vmul.f32 %v1339_v38, %v1335_v27  ;;  %v745_v41 = vmul.f32 %v1339_v38, %v1337_v32 }
 0x3ad   :  { %v743_v42 = vmul.f32 %v742_v39, %v311_v19  ;;  %v744_v43 = vmul.f32 %v742_v39, %v312_v20  ;;  %v746_v44 = vmul.f32 %v745_v41, %v397_v24  ;;  %v747_v45 = vmul.f32 %v745_v41, %v398_v25 }
 0x3ae   :  { %v763_v19 = vmul.f32 0.0625, %v762_v46 }
 0x3af   :  { %v1680_v47 = vadd.f32 %v746_v44, %v743_v42  ;;  %v1682_v48 = vadd.f32 %v747_v45, %v744_v43 }
 0x3b0   :  { %s1300_s17 = spop %1299 }
 0x3b1   :  { %v776_v49 = vstv %s1300_s17  ;;  %v795_v17 = vpack.c.bf16 %v1682_v48, %v1680_v47 }
 0x3b2   :  { %v777_v50 = vmul.f32 0.0625, %v776_v49  ;;  %v1291_v49 = vld [vmem:[#allocation7 + $0x38] sm:$0xff] }
 0x3b3   :  { %804 = vmatmul.bf16.vlgmr.msra.gmra.mxu2 %v795_v17  ;;  %957 = vmatpush.bf16.msra.mxu3 %v1291_v49  ;;  %v1290_v17 = vld [vmem:[#allocation7 + $0x30] sm:$0xff] }
 0x3b4   :  { %v778_v18 = vmax.f32 %v763_v19, %v777_v50 }
 0x3b6   :  { %v779_v20 = vsub.f32 %v763_v19, %v778_v18  ;;  %v782_v22 = vsub.f32 %v777_v50, %v778_v18  ;;  %v1289_v19 = vld [vmem:[#allocation7 + $0x28] sm:$0xff]  ;;  %v1288_v50 = vld [vmem:[#allocation7 + $0x20] sm:$0xff]  ;;  %v1287_v18 = vld [vmem:[#allocation7 + $0x18] sm:$0xff] }
 0x3b7   :  { %958 = vmatpush.bf16.msra.mxu3 %v1290_v17 }
 0x3b8   :  { %v780_v24 = vmul.f32 1.442695, %v779_v20  ;;  %v783_v51 = vmul.f32 1.442695, %v782_v22  ;;  %v1286_v20 = vld [vmem:[#allocation7 + $0x10] sm:$0xff]  ;;  %v1285_v22 = vld [vmem:[#allocation7 + $0x8] sm:$0xff] }
 0x3ba   :  { %1340 = vpow2.f32 %v780_v24  ;;  %v1284_v24 = vld [vmem:[#allocation7] sm:$0xff] }
 0x3bb   :  { %1342 = vpow2.f32 %v783_v51  ;;  %959 = vmatpush.bf16.msra.mxu3 %v1289_v19 }
 0x3bf   :  { %960 = vmatpush.bf16.msra.mxu3 %v1288_v50 }
 0x3c0   :  { %v1341_v23 = vpop.eup %1340 }
 0x3c1   :  { %v1343_v25 = vpop.eup %1342 }
 0x3c2   :  { %v785_v52 = vadd.f32 %v1343_v25, %v1341_v23 }
 0x3c3   :  { %961 = vmatpush.bf16.msra.mxu3 %v1287_v18 }
 0x3c4   :  { %1344 = vrcp.f32 %v785_v52 }
 0x3c7   :  { %962 = vmatpush.bf16.msra.mxu3 %v1286_v20 }
 0x3ca   :  { %v1345_v53 = vpop.eup %1344 }
 0x3cb   :  { %v787_v54 = vmul.f32 %v1345_v53, %v1341_v23  ;;  %v790_v55 = vmul.f32 %v1345_v53, %v1343_v25  ;;  %963 = vmatpush.bf16.msra.mxu3 %v1285_v22 }
 0x3cd   :  { %v788_v56 = vmul.f32 %v787_v54, %v483_v30  ;;  %v789_v57 = vmul.f32 %v787_v54, %v484_v29  ;;  %v791_v58 = vmul.f32 %v790_v55, %v565_v34  ;;  %v792_v59 = vmul.f32 %v790_v55, %v566_v35 }
 0x3cf   :  { %v1694_v60 = vadd.f32 %v791_v58, %v788_v56  ;;  %v1696_v61 = vadd.f32 %v792_v59, %v789_v57  ;;  %964 = vmatpush.bf16.msra.mxu3 %v1284_v24 }
 0x3d1   :  { %v832_v62 = vpack.c.bf16 %v1696_v61, %v1694_v60 }
 0x3d3   :  { %841 = vmatmul.bf16.vlgmr.msrb.gmra.mxu0 %v832_v62 }
 0x436   :  { %v805_v63 = vpop.f32.mrf.mxu2 }
 0x437   :  { %v806_v26 = vadd.f32 %v1641_v37, %v805_v63 }
 0x439   :  { %1346 = vtanh.f32 %v806_v26 }
 0x43e   :  { %v807_v28 = vpop.f32.mrf.mxu2 }
 0x43f   :  { %v1347_v29 = vpop.eup %1346  ;;  %v808_v30 = vadd.f32 %v1641_v37, %v807_v28 }
 0x440   :  { %v812_v31 = vmul.f32 %v1347_v29, %v1647_v40 }
 0x441   :  { %1348 = vtanh.f32 %v808_v30 }
 0x442   :  { %814 = vadd.xlane.f32.xlu0 %v812_v31 }
 0x447   :  { %v1349_v33 = vpop.eup %1348 }
 0x448   :  { %v813_v34 = vmul.f32 %v1349_v33, %v1647_v40 }
 0x44a   :  { %816 = vadd.xlane.f32.xlu1 %v813_v34 }
 0x450   :  { %v842_v35 = vpop.f32.mrf.mxu0 }
 0x451   :  { %v843_v0 = vadd.f32 %v1641_v37, %v842_v35 }
 0x453   :  { %1350 = vtanh.f32 %v843_v0 }
 0x458   :  { %v844_v1 = vpop.f32.mrf.mxu0 }
 0x459   :  { %v1351_v2 = vpop.eup %1350  ;;  %v845_v3 = vadd.f32 %v1641_v37, %v844_v1 }
 0x45a   :  { %v849_v4 = vmul.f32 %v1351_v2, %v1647_v40 }
 0x45b   :  { %1352 = vtanh.f32 %v845_v3 }
 0x45c   :  { %851 = vadd.xlane.f32.xlu2 %v849_v4 }
 0x461   :  { %v1353_v5 = vpop.eup %1352 }
 0x462   :  { %v850_v6 = vmul.f32 %v1353_v5, %v1647_v40 }
 0x464   :  { %853 = vadd.xlane.f32.xlu0 %v850_v6 }
 0x4b5   :  { %v815_v7 = vpop.xlane.xlu0 %814 }
 0x4b6   :  { %v818_v9 = vsel %vm704_vm3, %v815_v7, 0.0 }
 0x4bd   :  { %v817_v8 = vpop.xlane.xlu1 %816 }
 0x4be   :  { %v819_v10 = vsel %vm704_vm3, %v817_v8, 0.0 }
 0x4bf   :  { %v820_v11 = vadd.f32 %v819_v10, %v818_v9 }
 0x4c1   :  { %821 = vadd.xlane.f32.xlu1 %v820_v11 }
 0x4cf   :  { %v852_v12 = vpop.xlane.xlu2 %851 }
 0x4d0   :  { %v855_v37 = vsel %vm704_vm3, %v852_v12, 0.0 }
 0x4d7   :  { %v854_v13 = vpop.xlane.xlu0 %853 }
 0x4d8   :  { %v856_v14 = vsel %vm704_vm3, %v854_v13, 0.0 }
 0x4d9   :  { %v857_v15 = vadd.f32 %v856_v14, %v855_v37 }
 0x4db   :  { %858 = vadd.xlane.f32.xlu2 %v857_v15 }
 0x534   :  { %v822_v16 = vpop.xlane.xlu1 %821 }
 0x535   :  { %v823_v21 = vrot.slane %v822_v16, 4 }
 0x537   :  { %v824_v40 = vadd.f32 %v823_v21, %v822_v16 }
 0x539   :  { %v825_v27 = vrot.slane %v824_v40, 2 }
 0x53b   :  { %v826_v32 = vadd.f32 %v825_v27, %v824_v40 }
 0x53d   :  { %v827_v36 = vrot.slane %v826_v32, 1 }
 0x53f   :  { %v828_v38 = vadd.f32 %v827_v36, %v826_v32 }
 0x541   :  { %1301 = vpush %v828_v38 }
 0x54e   :  { %v859_v39 = vpop.xlane.xlu2 %858 }
 0x54f   :  { %v860_v41 = vrot.slane %v859_v39, 4 }
 0x551   :  { %v861_v42 = vadd.f32 %v860_v41, %v859_v39 }
 0x553   :  { %v862_v43 = vrot.slane %v861_v42, 2 }
 0x555   :  { %v863_v44 = vadd.f32 %v862_v43, %v861_v42 }
 0x557   :  { %v864_v45 = vrot.slane %v863_v44, 1 }
 0x559   :  { %v865_v46 = vadd.f32 %v864_v45, %v863_v44 }
 0x55b   :  { %1303 = vpush %v865_v46 }
 0x572   :  { %s1302_s6 = spop %1301 }
 0x573   :  { %v830_v51 = vstv %s1302_s6 }
 0x574   :  { %v831_v25 = vmul.f32 0.0625, %v830_v51 }
 0x58c   :  { %s1304_s18 = spop %1303 }
 0x58d   :  { %v867_v23 = vstv %s1304_s18 }
 0x58e   :  { %v868_v52 = vmul.f32 0.0625, %v867_v23 }
 0x590   :  { %v869_v53 = vmax.f32 %v831_v25, %v868_v52 }
 0x592   :  { %v870_v54 = vsub.f32 %v831_v25, %v869_v53  ;;  %v873_v55 = vsub.f32 %v868_v52, %v869_v53 }
 0x594   :  { %v871_v56 = vmul.f32 1.442695, %v870_v54  ;;  %v874_v57 = vmul.f32 1.442695, %v873_v55 }
 0x596   :  { %1354 = vpow2.f32 %v871_v56 }
 0x597   :  { %1356 = vpow2.f32 %v874_v57 }
 0x59c   :  { %v1355_v58 = vpop.eup %1354 }
 0x59d   :  { %v1357_v59 = vpop.eup %1356 }
 0x59e   :  { %v876_v62 = vadd.f32 %v1357_v59, %v1355_v58 }
 0x5a0   :  { %1358 = vrcp.f32 %v876_v62 }
 0x5a6   :  { %v1359_v63 = vpop.eup %1358 }
 0x5a7   :  { %v878_v26 = vmul.f32 %v1359_v63, %v1355_v58  ;;  %v881_v28 = vmul.f32 %v1359_v63, %v1357_v59 }
 0x5a9   :  { %v879_v29 = vmul.f32 %v878_v26, %v1680_v47  ;;  %v880_v30 = vmul.f32 %v878_v26, %v1682_v48  ;;  %v882_v31 = vmul.f32 %v881_v28, %v1694_v60  ;;  %v883_v33 = vmul.f32 %v881_v28, %v1696_v61  ;;  %v1317_v47 = vld [vmem:[%s1735_s10] ss:$0 sm:$0xff] }
 0x5ab   :  { %v884_v34 = vadd.f32 %v882_v31, %v879_v29  ;;  %v885_v35 = vadd.f32 %v883_v33, %v880_v30 }
 0x5ad   :  { %886 = vst [vmem:[#allocation9] sm:$0xff] %v884_v34  ;;  %v888_v0 = vpack.c.bf16 %v885_v35, %v884_v34 }
 0x5ae   :  { %887 = vst [vmem:[#allocation9 + $0x8] sm:$0xff] %v885_v35 }
 0x5af   :  { %965 = vmatmul.bf16.vlgmr.msra.gmra.mxu3 %v888_v0  ;;  %998 = dma.vmem_to_hbm [thread:$0]  %s991_s19, 256, %s993_s21, [#allocation10], %s1494_s22, %s1494_s22, %s1495_s23  }
 0x632   :  { %v966_v48 = vpop.f32.mrf.mxu3 }
 0x633   :  { %v967_v60 = vadd.f32 %v1317_v47, %v966_v48 }
 0x635   :  { %971 = vst [vmem:[#allocation8] sm:$0xff] %v967_v60 }
 0x63a   :  { %v968_v61 = vpop.f32.mrf.mxu3 }
 0x63b   :  { %v969_v1 = vadd.f32 %v1317_v47, %v968_v61 }
 0x63d   :  { %972 = vst [vmem:[#allocation8 + $0x8] sm:$0xff] %v969_v1 }
 0x63e   :  { %985 = dma.vmem_to_hbm [thread:$0]  %s978_s25, 256, %s980_s27, [#allocation4], %s1494_s22, %s1494_s22, %s1495_s23  }
 0x63f   :  { %1484 = dma.done.wait [#allocation4], 256  }
 0x640   :  { %1485 = vsyncadd [#allocation4], 4294967040 }
 0x641   :  { %1486 = dma.done.wait [#allocation10], 256  }
 0x642   :  { %1487 = vsyncadd [#allocation10], 4294967040 }
 0x643   :  { %1007 = vsyncpa [#allocation3], 1 }
 0x644   :  { %1008 = vsyncpa [#allocation6], 1 }
 0x645   :  { %1009 = vsyncpa [#allocation4], 1 }
 0x646   :  { %1010 = vsyncpa [#allocation10], 1 }

</bundles_post_ra>
